<compile_context>
chip_gen: v7x
topology: tpu7x:2x2x1
jax: 0.10.0
libtpu: 0.0.40
codegen_flags: <defaults>
</compile_context>

<pallas_src>
import numpy as np
import jax
import jax.numpy as jnp
from jax.experimental import pallas as pl
from jax.experimental.pallas import tpu as pltpu

# ---------------- config (small synthetic shapes) ----------------
HIDDEN = 32              # transformer.d_model
H2 = HIDDEN * 2          # hidden_dim * 2 used by the MLP heads
NUM_NOUN = 16            # num_noun_classes (small synthetic value)
NUM_ROLE_TOKENS = 190    # as in CoFormer.__init__
NUM_VERB_TOKENS = 504    # as in CoFormer.__init__
NUM_DEC_LAYERS = 2       # decoder layers producing extracted_rhs
MAX_NUM_ROLES = 6
BACKBONE_CHANNELS = 4    # backbone.num_channels (small synthetic value)
IMG_CHANNELS = 3

ROLE_ROWS = 8            # MAX_NUM_ROLES padded to a full sublane group
ACT_W = 64               # activation lanes: [role(0:32) | x_mean(32:35) | 0 | mask(63)]
MASK_LANE = ACT_W - 1

VERB_PAD = 512           # verb logits padded to 4 full lane tiles
SLAB_W = 128             # role-output lane slab width
SLAB_USED = 3 * NUM_NOUN + 4 + 1     # noun1|noun2|noun3|bbox|conf = 53 lanes
OUT_W = SLAB_W + VERB_PAD            # single merged output width = 640

# weight slab A (depth <= 96), all column offsets lane-tile aligned
WA_ROWS = 3 * HIDDEN     # 96
WA_COLS = 1024
PW_COL = 0               # folded input_proj, contraction over the ACT_W lanes
VERB_COL = 128           # verb_token_embed.T
BD1_COL = 640            # block-diag of [noun1 | noun2 | noun3/bbox/conf layer-1]
BD1_W = 3 * H2 + 2 * NUM_NOUN        # 224
BW3_COL = 896            # bbox predictor third layer
# weight slab B (depth 192): block-diag of [noun3 | bbox | conf] second layers
WB_ROWS = 3 * H2         # 192
WB_COLS = 128
BD2_W = H2 + NUM_NOUN + 1            # 81
B_COLS = 256             # bias slab width


# ---------------- fused Pallas kernel (single invocation, no grid) ----------------
def _coformer_fused_kernel(acts_ref, wa_ref, wb_ref, b_ref, o_ref):
    f32 = jnp.float32
    acts = acts_ref[...]                                   # (R, 64), R = B*ROLE_ROWS
    rows = acts.shape[0]
    roles = acts[:, 0:HIDDEN]                              # (R, 32) role token embeds
    mask = acts[:, MASK_LANE:MASK_LANE + 1]                # (R, 1) role-row validity

    # 1) input_proj (1x1 conv) applied to the spatially-averaged image feature.
    #    The x_mean lanes are broadcast to every role row of the image, so
    #    `pooled` is already aligned with the role rows (no sublane gather).
    pooled = jnp.dot(acts, wa_ref[0:ACT_W, PW_COL:PW_COL + HIDDEN],
                     preferred_element_type=f32) + b_ref[0:1, 0:HIDDEN]

    # 2) verb head: pooled @ verb_token_embed.T (padded to 512 lanes), stored
    #    into the merged output slab at a lane-tile-aligned offset.
    o_ref[:, SLAB_W:SLAB_W + VERB_PAD] = jnp.dot(
        pooled, wa_ref[0:HIDDEN, VERB_COL:VERB_COL + VERB_PAD],
        preferred_element_type=f32)

    # 3) transformer stub role features (last decoder layer only).
    # TODO(synk): `transformer` is an external module; its outputs are replaced by
    # deterministic functions of the projected feature + role token embeddings.
    extracted = (0.1 * NUM_DEC_LAYERS) * (roles + pooled)
    aggregated = 0.05 * (roles + pooled)
    final = 0.1 * roles + pooled

    def layer_norm(v, grow, brow):
        m = jnp.mean(v, axis=-1, keepdims=True)
        var = jnp.mean(jnp.square(v - m), axis=-1, keepdims=True)
        return ((v - m) * jax.lax.rsqrt(var + 1e-5)
                * b_ref[grow:grow + 1, 0:HIDDEN] + b_ref[brow:brow + 1, 0:HIDDEN])

    # 4) ALL first-layer heads as one block-diagonal MXU push:
    #    [ln1(extracted) | ln2(aggregated) | final] (96 lanes) x (96, 224).
    #    Output lanes: [noun3_h|bbox_h|conf_h (0:192) | noun1 (192:208) | noun2 (208:224)]
    cat1 = jnp.concatenate([layer_norm(extracted, 1, 2),
                            layer_norm(aggregated, 3, 4), final], axis=-1)
    a_out = jnp.dot(cat1, wa_ref[0:3 * HIDDEN, BD1_COL:BD1_COL + BD1_W],
                    preferred_element_type=f32) + b_ref[5:6, 0:BD1_W]
    h = jnp.maximum(a_out[:, 0:3 * H2], 0.0)               # (R, 192) ReLU hidden
    n1n2 = a_out[:, 3 * H2:BD1_W]                          # (R, 32)  noun1|noun2

    # 5) noun3 / bbox / conf second layers as one block-diagonal matmul.
    #    Output lanes: [bbox_hidden2 (0:64) | noun3 (64:80) | conf (80:81)]
    b_out = jnp.dot(h, wb_ref[0:WB_ROWS, 0:BD2_W],
                    preferred_element_type=f32) + b_ref[6:7, 0:BD2_W]
    hb2 = jnp.maximum(b_out[:, 0:H2], 0.0)
    n3 = b_out[:, H2:H2 + NUM_NOUN]
    conf = b_out[:, H2 + NUM_NOUN:BD2_W]

    # 6) bbox third layer + sigmoid.
    bbox = jax.nn.sigmoid(
        jnp.dot(hb2, wa_ref[0:H2, BW3_COL:BW3_COL + 4],
                preferred_element_type=f32) + b_ref[7:8, 0:4])

    # 7) masked lane-dense role-output stores (== F.pad-to-MAX_NUM_ROLES semantics).
    # TODO(synk): dropout layers in the MLP heads are identity (eval semantics).
    o_ref[:, 0:2 * NUM_NOUN] = n1n2 * mask
    o_ref[:, 2 * NUM_NOUN:3 * NUM_NOUN] = n3 * mask
    o_ref[:, 3 * NUM_NOUN:3 * NUM_NOUN + 4] = bbox * mask
    o_ref[:, 3 * NUM_NOUN + 4:SLAB_USED] = conf * mask
    o_ref[:, SLAB_USED:SLAB_W] = jnp.zeros((rows, SLAB_W - SLAB_USED), f32)


def _fused_call(acts, wa, wb, bias):
    rows = acts.shape[0]
    vmem = pl.BlockSpec(memory_space=pltpu.MemorySpace.VMEM)
    return pl.pallas_call(
        _coformer_fused_kernel,
        out_shape=jax.ShapeDtypeStruct((rows, OUT_W), jnp.float32),
        in_specs=[vmem, vmem, vmem, vmem],
        out_specs=pl.BlockSpec(memory_space=pltpu.MemorySpace.VMEM),
    )(acts, wa, wb, bias)


# ---------------- parameters ----------------
def init_params(key):
    def nrm(k, shape, scale=0.02):
        return (scale * jax.random.normal(k, shape)).astype(jnp.float32)
    ks = jax.random.split(key, 32)
    H, C = HIDDEN, NUM_NOUN
    return dict(
        role_token_embed=nrm(ks[0], (NUM_ROLE_TOKENS, H)),
        verb_token_embed=nrm(ks[1], (NUM_VERB_TOKENS, H)),
        IL_token_embed=nrm(ks[2], (1, H)),
        RL_token_embed=nrm(ks[3], (1, H)),
        input_proj_w=nrm(ks[4], (BACKBONE_CHANNELS, H)),  # Conv2d 1x1 as (Cin, hidden)
        input_proj_b=nrm(ks[5], (H,)),
        noun1_w=nrm(ks[6], (H, C)), noun1_b=nrm(ks[7], (C,)),
        noun2_w=nrm(ks[8], (H, C)), noun2_b=nrm(ks[9], (C,)),
        noun3_w1=nrm(ks[10], (H, H2)), noun3_b1=nrm(ks[11], (H2,)),
        noun3_w2=nrm(ks[12], (H2, C)), noun3_b2=nrm(ks[13], (C,)),
        bbox_w1=nrm(ks[14], (H, H2)), bbox_b1=nrm(ks[15], (H2,)),
        bbox_w2=nrm(ks[16], (H2, H2)), bbox_b2=nrm(ks[17], (H2,)),
        bbox_w3=nrm(ks[18], (H2, 4)), bbox_b3=nrm(ks[19], (4,)),
        conf_w1=nrm(ks[20], (H, H2)), conf_b1=nrm(ks[21], (H2,)),
        conf_w2=nrm(ks[22], (H2, 1)), conf_b2=nrm(ks[23], (1,)),
        ln1_g=jnp.ones((H,), jnp.float32), ln1_b=jnp.zeros((H,), jnp.float32),
        ln2_g=jnp.ones((H,), jnp.float32), ln2_b=jnp.zeros((H,), jnp.float32),
        backbone_proj=nrm(ks[24], (IMG_CHANNELS, BACKBONE_CHANNELS), scale=0.5),
    )


def prepare_params(p):
    """One-time weight prep: fold the (linear) backbone channel projection into the
    1x1 input_proj, transpose/pad the verb embedding, and pack everything into two
    block-diagonal weight slabs + one bias slab (lane-tile aligned offsets)."""
    f32 = jnp.float32
    H, C = HIDDEN, NUM_NOUN
    # backbone 3->num_channels proj folded into the 1x1 conv (both linear).
    wproj = (p['backbone_proj'] @ p['input_proj_w']).astype(f32)     # (3, H)

    wa = jnp.zeros((WA_ROWS, WA_COLS), f32)
    # input_proj: contraction over the ACT_W activation lanes; only the x_mean
    # lanes (HIDDEN:HIDDEN+3) carry weight, role/mask lanes stay zero.
    wa = wa.at[HIDDEN:HIDDEN + IMG_CHANNELS, PW_COL:PW_COL + H].set(wproj)
    wa = wa.at[0:H, VERB_COL:VERB_COL + NUM_VERB_TOKENS].set(p['verb_token_embed'].T)
    # block-diag 1: rows [ln1x | ln2x | final], cols [headcat(192) | noun1 | noun2]
    wa = wa.at[0:H, BD1_COL + 3 * H2:BD1_COL + 3 * H2 + C].set(p['noun1_w'])
    wa = wa.at[H:2 * H, BD1_COL + 3 * H2 + C:BD1_COL + 3 * H2 + 2 * C].set(p['noun2_w'])
    headcat = jnp.concatenate([p['noun3_w1'], p['bbox_w1'], p['conf_w1']], axis=1)
    wa = wa.at[2 * H:3 * H, BD1_COL:BD1_COL + 3 * H2].set(headcat)
    wa = wa.at[0:H2, BW3_COL:BW3_COL + 4].set(p['bbox_w3'])

    wb = jnp.zeros((WB_ROWS, WB_COLS), f32)
    # block-diag 2: rows [noun3_h | bbox_h | conf_h], cols [bbox_hidden2 | noun3 | conf]
    wb = wb.at[0:H2, H2:H2 + C].set(p['noun3_w2'])
    wb = wb.at[H2:2 * H2, 0:H2].set(p['bbox_w2'])
    wb = wb.at[2 * H2:3 * H2, H2 + C:H2 + C + 1].set(p['conf_w2'])

    bs = jnp.zeros((8, B_COLS), f32)
    bs = bs.at[0, 0:H].set(p['input_proj_b'])
    bs = bs.at[1, 0:H].set(p['ln1_g'])
    bs = bs.at[2, 0:H].set(p['ln1_b'])
    bs = bs.at[3, 0:H].set(p['ln2_g'])
    bs = bs.at[4, 0:H].set(p['ln2_b'])
    bs = bs.at[5, 0:BD1_W].set(jnp.concatenate(
        [p['noun3_b1'], p['bbox_b1'], p['conf_b1'], p['noun1_b'], p['noun2_b']]))
    bs = bs.at[6, 0:BD2_W].set(jnp.concatenate(
        [p['bbox_b2'], p['noun3_b2'], p['conf_b2']]))
    bs = bs.at[7, 0:4].set(p['bbox_b3'])

    return {'role_token_embed': p['role_token_embed'].astype(f32),
            'wa': wa, 'wb': wb, 'bias': bs}


# ---------------- forward ----------------
def _build_role_selection(verbs, vidx_ridx):
    """Host-side: pad selected roles to MAX_NUM_ROLES + per-row validity (static shapes)."""
    B = len(verbs)
    sel = np.zeros((B, MAX_NUM_ROLES), dtype=np.int32)
    msk = np.zeros((B, ROLE_ROWS, 1), dtype=np.float32)
    for i, v in enumerate(verbs):
        roles = vidx_ridx[int(v)]
        n = len(roles)
        sel[i, :n] = np.asarray(roles, dtype=np.int32)
        msk[i, :n, 0] = 1.0
    return jnp.asarray(sel), jnp.asarray(msk)


@jax.jit
def _forward_jit(prep, samples, sel, msk):
    B, C, _, _ = samples.shape
    # TODO(synk): `backbone` is an external module (ResNet); stubbed with global
    # average pooling (the spatial mean commutes with the folded linear 1x1
    # input_proj, so only the per-image channel mean reaches the kernel).
    # Positional encodings / padding masks only feed the (also stubbed)
    # transformer and are omitted.
    x_mean = jnp.mean(samples, axis=(2, 3))                     # (B, C)

    roles = prep['role_token_embed'][sel]                       # (B, 6, HIDDEN)

    # Build one lane-dense activation slab: lanes [role | x_mean | ... | mask].
    acts = jnp.zeros((B, ROLE_ROWS, ACT_W), jnp.float32)
    acts = acts.at[:, :MAX_NUM_ROLES, 0:HIDDEN].set(roles)
    acts = acts.at[:, :, HIDDEN:HIDDEN + C].set(
        jnp.broadcast_to(x_mean[:, None, :], (B, ROLE_ROWS, C)))
    acts = acts.at[:, :, MASK_LANE].set(msk[:, :, 0])
    acts = acts.reshape(B * ROLE_ROWS, ACT_W)

    out = _fused_call(acts, prep['wa'], prep['wb'], prep['bias'])
    out = out.reshape(B, ROLE_ROWS, OUT_W)
    r = out[:, :MAX_NUM_ROLES, :]
    return {
        'pred_verb': out[:, 0, SLAB_W:SLAB_W + NUM_VERB_TOKENS],
        'pred_noun_1': r[:, :, 0:NUM_NOUN],
        'pred_noun_2': r[:, :, NUM_NOUN:2 * NUM_NOUN],
        'pred_noun_3': r[:, :, 2 * NUM_NOUN:3 * NUM_NOUN],
        'pred_bbox': r[:, :, 3 * NUM_NOUN:3 * NUM_NOUN + 4],
        'pred_bbox_conf': r[:, :, 3 * NUM_NOUN + 4:3 * NUM_NOUN + 5],
    }


def coformer_forward(prep_params, samples, verbs, vidx_ridx):
    sel, msk = _build_role_selection(verbs, vidx_ridx)
    return _forward_jit(prep_params, samples, sel, msk)


if __name__ == "__main__":
    key = jax.random.PRNGKey(0)
    pkey, skey = jax.random.split(key)
    params = init_params(pkey)
    prep = prepare_params(params)               # one-time weight prep (hoisted)

    samples = jax.random.normal(skey, (2, 3, 16, 16), dtype=jnp.float32)  # NCHW
    # verb index -> role indices (small synthetic vidx_ridx)
    vidx_ridx = [[0, 1, 2], [3, 4, 5, 6], [7, 8]]
    verbs = [1, 0]  # per-image ground-truth verbs (targets) -> 4 and 3 selected roles

    out = coformer_forward(prep, samples, verbs, vidx_ridx)
    out = {k: jax.block_until_ready(v) for k, v in out.items()}

    assert out['pred_verb'].shape == (2, NUM_VERB_TOKENS)
    assert out['pred_noun_1'].shape == (2, MAX_NUM_ROLES, NUM_NOUN)
    assert out['pred_noun_2'].shape == (2, MAX_NUM_ROLES, NUM_NOUN)
    assert out['pred_noun_3'].shape == (2, MAX_NUM_ROLES, NUM_NOUN)
    assert out['pred_bbox'].shape == (2, MAX_NUM_ROLES, 4)
    assert out['pred_bbox_conf'].shape == (2, MAX_NUM_ROLES, 1)
    print("KERNEL_OK")
</pallas_src>

<mosaic_0001>
module attributes {stable_mosaic.version = 11 : i64} {
  func.func @_coformer_fused_kernel(%arg0: memref<16x64xf32, #tpu.memory_space<vmem>>, %arg1: memref<96x1024xf32, #tpu.memory_space<vmem>>, %arg2: memref<192x128xf32, #tpu.memory_space<vmem>>, %arg3: memref<8x256xf32, #tpu.memory_space<vmem>>, %arg4: memref<16x640xf32, #tpu.memory_space<vmem>>) attributes {dimension_semantics = [], scalar_prefetch = 0 : i64, scratch_operands = 0 : i64, tpu.core_type = #tpu.core_type<tc>} {
    %c0 = arith.constant 0 : index
    %c0_0 = arith.constant 0 : index
    %0 = vector.load %arg0[%c0, %c0_0] : memref<16x64xf32, #tpu.memory_space<vmem>>, vector<16x64xf32>
    %1 = vector.extract_strided_slice %0 {offsets = [0, 0], sizes = [16, 32], strides = [1, 1]} : vector<16x64xf32> to vector<16x32xf32>
    %2 = vector.extract_strided_slice %0 {offsets = [0, 63], sizes = [16, 1], strides = [1, 1]} : vector<16x64xf32> to vector<16x1xf32>
    %c0_1 = arith.constant 0 : index
    %c0_2 = arith.constant 0 : index
    %3 = vector.load %arg1[%c0_1, %c0_2] : memref<96x1024xf32, #tpu.memory_space<vmem>>, vector<64x32xf32>
    %cst = arith.constant dense<0.000000e+00> : vector<16x32xf32>
    %4 = tpu.matmul %0, %3, %cst {dimension_numbers = #tpu.dot_dimension_numbers<[1], [0], [0], [1], [0, 0, 1, 1], [], []>} : vector<16x64xf32>, vector<64x32xf32>, vector<16x32xf32> -> vector<16x32xf32>
    %c0_3 = arith.constant 0 : index
    %c0_4 = arith.constant 0 : index
    %5 = vector.load %arg3[%c0_3, %c0_4] : memref<8x256xf32, #tpu.memory_space<vmem>>, vector<1x32xf32>
    %6 = vector.broadcast %5 : vector<1x32xf32> to vector<16x32xf32>
    %7 = arith.addf %4, %6 : vector<16x32xf32>
    %c0_5 = arith.constant 0 : index
    %c128 = arith.constant 128 : index
    %8 = vector.load %arg1[%c0_5, %c128] : memref<96x1024xf32, #tpu.memory_space<vmem>>, vector<32x512xf32>
    %cst_6 = arith.constant dense<0.000000e+00> : vector<16x512xf32>
    %9 = tpu.matmul %7, %8, %cst_6 {dimension_numbers = #tpu.dot_dimension_numbers<[1], [0], [0], [1], [0, 0, 1, 1], [], []>} : vector<16x32xf32>, vector<32x512xf32>, vector<16x512xf32> -> vector<16x512xf32>
    %c0_7 = arith.constant 0 : index
    %c128_8 = arith.constant 128 : index
    %10 = vector.load %arg4[%c0_7, %c128_8] : memref<16x640xf32, #tpu.memory_space<vmem>>, vector<16x512xf32>
    tpu.vector_store %arg4[%c0_7, %c128_8], %9 {strides = array<i32>} : memref<16x640xf32, #tpu.memory_space<vmem>>, vector<16x512xf32>,
    %11 = arith.addf %1, %7 : vector<16x32xf32>
    %cst_9 = arith.constant 2.000000e-01 : f32
    %12 = vector.broadcast %cst_9 : f32 to vector<16x32xf32>
    %13 = arith.mulf %12, %11 : vector<16x32xf32>
    %14 = arith.addf %1, %7 : vector<16x32xf32>
    %cst_10 = arith.constant 5.000000e-02 : f32
    %15 = vector.broadcast %cst_10 : f32 to vector<16x32xf32>
    %16 = arith.mulf %15, %14 : vector<16x32xf32>
    %cst_11 = arith.constant 1.000000e-01 : f32
    %17 = vector.broadcast %cst_11 : f32 to vector<16x32xf32>
    %18 = arith.mulf %17, %1 : vector<16x32xf32>
    %19 = arith.addf %18, %7 : vector<16x32xf32>
    %cst_12 = arith.constant dense<0.000000e+00> : vector<16xf32>
    %20 = vector.multi_reduction <add>, %13, %cst_12 [1] : vector<16x32xf32> to vector<16xf32>
    %21 = vector.shape_cast %20 : vector<16xf32> to vector<16x1xf32>
    %cst_13 = arith.constant 3.200000e+01 : f32
    %22 = vector.broadcast %cst_13 : f32 to vector<16x1xf32>
    %23 = arith.divf %21, %22 : vector<16x1xf32>
    %24 = vector.broadcast %23 : vector<16x1xf32> to vector<16x32xf32>
    %25 = arith.subf %13, %24 : vector<16x32xf32>
    %26 = arith.mulf %25, %25 : vector<16x32xf32>
    %cst_14 = arith.constant dense<0.000000e+00> : vector<16xf32>
    %27 = vector.multi_reduction <add>, %26, %cst_14 [1] : vector<16x32xf32> to vector<16xf32>
    %28 = vector.shape_cast %27 : vector<16xf32> to vector<16x1xf32>
    %cst_15 = arith.constant 3.200000e+01 : f32
    %29 = vector.broadcast %cst_15 : f32 to vector<16x1xf32>
    %30 = arith.divf %28, %29 : vector<16x1xf32>
    %31 = vector.broadcast %23 : vector<16x1xf32> to vector<16x32xf32>
    %32 = arith.subf %13, %31 : vector<16x32xf32>
    %cst_16 = arith.constant 9.99999974E-6 : f32
    %33 = vector.broadcast %cst_16 : f32 to vector<16x1xf32>
    %34 = arith.addf %30, %33 : vector<16x1xf32>
    %35 = math.rsqrt %34 : vector<16x1xf32>
    %36 = vector.broadcast %35 : vector<16x1xf32> to vector<16x32xf32>
    %37 = arith.mulf %32, %36 : vector<16x32xf32>
    %c1 = arith.constant 1 : index
    %c0_17 = arith.constant 0 : index
    %38 = vector.load %arg3[%c1, %c0_17] : memref<8x256xf32, #tpu.memory_space<vmem>>, vector<1x32xf32>
    %39 = vector.broadcast %38 : vector<1x32xf32> to vector<16x32xf32>
    %40 = arith.mulf %37, %39 : vector<16x32xf32>
    %c2 = arith.constant 2 : index
    %c0_18 = arith.constant 0 : index
    %41 = vector.load %arg3[%c2, %c0_18] : memref<8x256xf32, #tpu.memory_space<vmem>>, vector<1x32xf32>
    %42 = vector.broadcast %41 : vector<1x32xf32> to vector<16x32xf32>
    %43 = arith.addf %40, %42 : vector<16x32xf32>
    %cst_19 = arith.constant dense<0.000000e+00> : vector<16xf32>
    %44 = vector.multi_reduction <add>, %16, %cst_19 [1] : vector<16x32xf32> to vector<16xf32>
    %45 = vector.shape_cast %44 : vector<16xf32> to vector<16x1xf32>
    %cst_20 = arith.constant 3.200000e+01 : f32
    %46 = vector.broadcast %cst_20 : f32 to vector<16x1xf32>
    %47 = arith.divf %45, %46 : vector<16x1xf32>
    %48 = vector.broadcast %47 : vector<16x1xf32> to vector<16x32xf32>
    %49 = arith.subf %16, %48 : vector<16x32xf32>
    %50 = arith.mulf %49, %49 : vector<16x32xf32>
    %cst_21 = arith.constant dense<0.000000e+00> : vector<16xf32>
    %51 = vector.multi_reduction <add>, %50, %cst_21 [1] : vector<16x32xf32> to vector<16xf32>
    %52 = vector.shape_cast %51 : vector<16xf32> to vector<16x1xf32>
    %cst_22 = arith.constant 3.200000e+01 : f32
    %53 = vector.broadcast %cst_22 : f32 to vector<16x1xf32>
    %54 = arith.divf %52, %53 : vector<16x1xf32>
    %55 = vector.broadcast %47 : vector<16x1xf32> to vector<16x32xf32>
    %56 = arith.subf %16, %55 : vector<16x32xf32>
    %cst_23 = arith.constant 9.99999974E-6 : f32
    %57 = vector.broadcast %cst_23 : f32 to vector<16x1xf32>
    %58 = arith.addf %54, %57 : vector<16x1xf32>
    %59 = math.rsqrt %58 : vector<16x1xf32>
    %60 = vector.broadcast %59 : vector<16x1xf32> to vector<16x32xf32>
    %61 = arith.mulf %56, %60 : vector<16x32xf32>
    %c3 = arith.constant 3 : index
    %c0_24 = arith.constant 0 : index
    %62 = vector.load %arg3[%c3, %c0_24] : memref<8x256xf32, #tpu.memory_space<vmem>>, vector<1x32xf32>
    %63 = vector.broadcast %62 : vector<1x32xf32> to vector<16x32xf32>
    %64 = arith.mulf %61, %63 : vector<16x32xf32>
    %c4 = arith.constant 4 : index
    %c0_25 = arith.constant 0 : index
    %65 = vector.load %arg3[%c4, %c0_25] : memref<8x256xf32, #tpu.memory_space<vmem>>, vector<1x32xf32>
    %66 = vector.broadcast %65 : vector<1x32xf32> to vector<16x32xf32>
    %67 = arith.addf %64, %66 : vector<16x32xf32>
    %68 = tpu.concatenate %43, %67, %19 in 1 : vector<16x32xf32>, vector<16x32xf32>, vector<16x32xf32> -> vector<16x96xf32>
    %c0_26 = arith.constant 0 : index
    %c640 = arith.constant 640 : index
    %69 = vector.load %arg1[%c0_26, %c640] : memref<96x1024xf32, #tpu.memory_space<vmem>>, vector<96x224xf32>
    %cst_27 = arith.constant dense<0.000000e+00> : vector<16x224xf32>
    %70 = tpu.matmul %68, %69, %cst_27 {dimension_numbers = #tpu.dot_dimension_numbers<[1], [0], [0], [1], [0, 0, 1, 1], [], []>} : vector<16x96xf32>, vector<96x224xf32>, vector<16x224xf32> -> vector<16x224xf32>
    %c5 = arith.constant 5 : index
    %c0_28 = arith.constant 0 : index
    %71 = vector.load %arg3[%c5, %c0_28] : memref<8x256xf32, #tpu.memory_space<vmem>>, vector<1x224xf32>
    %72 = vector.broadcast %71 : vector<1x224xf32> to vector<16x224xf32>
    %73 = arith.addf %70, %72 : vector<16x224xf32>
    %74 = vector.extract_strided_slice %73 {offsets = [0, 0], sizes = [16, 192], strides = [1, 1]} : vector<16x224xf32> to vector<16x192xf32>
    %cst_29 = arith.constant 0.000000e+00 : f32
    %75 = vector.broadcast %cst_29 : f32 to vector<16x192xf32>
    %76 = arith.maximumf %74, %75 : vector<16x192xf32>
    %77 = vector.extract_strided_slice %73 {offsets = [0, 192], sizes = [16, 32], strides = [1, 1]} : vector<16x224xf32> to vector<16x32xf32>
    %c0_30 = arith.constant 0 : index
    %c0_31 = arith.constant 0 : index
    %78 = vector.load %arg2[%c0_30, %c0_31] : memref<192x128xf32, #tpu.memory_space<vmem>>, vector<192x81xf32>
    %cst_32 = arith.constant dense<0.000000e+00> : vector<16x81xf32>
    %79 = tpu.matmul %76, %78, %cst_32 {dimension_numbers = #tpu.dot_dimension_numbers<[1], [0], [0], [1], [0, 0, 1, 1], [], []>} : vector<16x192xf32>, vector<192x81xf32>, vector<16x81xf32> -> vector<16x81xf32>
    %c6 = arith.constant 6 : index
    %c0_33 = arith.constant 0 : index
    %80 = vector.load %arg3[%c6, %c0_33] : memref<8x256xf32, #tpu.memory_space<vmem>>, vector<1x81xf32>
    %81 = vector.broadcast %80 : vector<1x81xf32> to vector<16x81xf32>
    %82 = arith.addf %79, %81 : vector<16x81xf32>
    %83 = vector.extract_strided_slice %82 {offsets = [0, 0], sizes = [16, 64], strides = [1, 1]} : vector<16x81xf32> to vector<16x64xf32>
    %cst_34 = arith.constant 0.000000e+00 : f32
    %84 = vector.broadcast %cst_34 : f32 to vector<16x64xf32>
    %85 = arith.maximumf %83, %84 : vector<16x64xf32>
    %86 = vector.extract_strided_slice %82 {offsets = [0, 64], sizes = [16, 16], strides = [1, 1]} : vector<16x81xf32> to vector<16x16xf32>
    %87 = vector.extract_strided_slice %82 {offsets = [0, 80], sizes = [16, 1], strides = [1, 1]} : vector<16x81xf32> to vector<16x1xf32>
    %c0_35 = arith.constant 0 : index
    %c896 = arith.constant 896 : index
    %88 = vector.load %arg1[%c0_35, %c896] : memref<96x1024xf32, #tpu.memory_space<vmem>>, vector<64x4xf32>
    %cst_36 = arith.constant dense<0.000000e+00> : vector<16x4xf32>
    %89 = tpu.matmul %85, %88, %cst_36 {dimension_numbers = #tpu.dot_dimension_numbers<[1], [0], [0], [1], [0, 0, 1, 1], [], []>} : vector<16x64xf32>, vector<64x4xf32>, vector<16x4xf32> -> vector<16x4xf32>
    %c7 = arith.constant 7 : index
    %c0_37 = arith.constant 0 : index
    %90 = vector.load %arg3[%c7, %c0_37] : memref<8x256xf32, #tpu.memory_space<vmem>>, vector<1x4xf32>
    %91 = vector.broadcast %90 : vector<1x4xf32> to vector<16x4xf32>
    %92 = arith.addf %89, %91 : vector<16x4xf32>
    %93 = arith.negf %92 : vector<16x4xf32>
    %94 = math.exp %93 : vector<16x4xf32>
    %cst_38 = arith.constant 1.000000e+00 : f32
    %95 = vector.broadcast %cst_38 : f32 to vector<16x4xf32>
    %96 = arith.addf %95, %94 : vector<16x4xf32>
    %97 = arith.divf %95, %96 : vector<16x4xf32>
    %98 = vector.broadcast %2 : vector<16x1xf32> to vector<16x32xf32>
    %99 = arith.mulf %77, %98 : vector<16x32xf32>
    %c0_39 = arith.constant 0 : index
    %c0_40 = arith.constant 0 : index
    %100 = vector.load %arg4[%c0_39, %c0_40] : memref<16x640xf32, #tpu.memory_space<vmem>>, vector<16x32xf32>
    tpu.vector_store %arg4[%c0_39, %c0_40], %99 {strides = array<i32>} : memref<16x640xf32, #tpu.memory_space<vmem>>, vector<16x32xf32>,
    %101 = vector.broadcast %2 : vector<16x1xf32> to vector<16x16xf32>
    %102 = arith.mulf %86, %101 : vector<16x16xf32>
    %c0_41 = arith.constant 0 : index
    %c32 = arith.constant 32 : index
    %103 = vector.load %arg4[%c0_41, %c32] : memref<16x640xf32, #tpu.memory_space<vmem>>, vector<16x16xf32>
    tpu.vector_store %arg4[%c0_41, %c32], %102 {strides = array<i32>} : memref<16x640xf32, #tpu.memory_space<vmem>>, vector<16x16xf32>,
    %104 = vector.broadcast %2 : vector<16x1xf32> to vector<16x4xf32>
    %105 = arith.mulf %97, %104 : vector<16x4xf32>
    %c0_42 = arith.constant 0 : index
    %c48 = arith.constant 48 : index
    %106 = vector.load %arg4[%c0_42, %c48] : memref<16x640xf32, #tpu.memory_space<vmem>>, vector<16x4xf32>
    tpu.vector_store %arg4[%c0_42, %c48], %105 {strides = array<i32>} : memref<16x640xf32, #tpu.memory_space<vmem>>, vector<16x4xf32>,
    %107 = arith.mulf %87, %2 : vector<16x1xf32>
    %c0_43 = arith.constant 0 : index
    %c52 = arith.constant 52 : index
    %108 = vector.load %arg4[%c0_43, %c52] : memref<16x640xf32, #tpu.memory_space<vmem>>, vector<16x1xf32>
    tpu.vector_store %arg4[%c0_43, %c52], %107 {strides = array<i32>} : memref<16x640xf32, #tpu.memory_space<vmem>>, vector<16x1xf32>,
    %cst_44 = arith.constant 0.000000e+00 : f32
    %109 = vector.broadcast %cst_44 : f32 to vector<16x75xf32>
    %c0_45 = arith.constant 0 : index
    %c53 = arith.constant 53 : index
    %110 = vector.load %arg4[%c0_45, %c53] : memref<16x640xf32, #tpu.memory_space<vmem>>, vector<16x75xf32>
    tpu.vector_store %arg4[%c0_45, %c53], %109 {strides = array<i32>} : memref<16x640xf32, #tpu.memory_space<vmem>>, vector<16x75xf32>,
    return
  }
}

</mosaic_0001>

<bundles_post_ra>
// kernel: _forward_jit.1
= control target key start
LH: loop header
LB: loop body
LE: loop exit
PB: predicated region body
PF: predicated region fallthrough
CT: control target
= control target key end

     0   :  { %9 = vsyncpa [#allocation3], 0  ;;  %s1046_s15 = smov [#allocation2]   ;;  %s1349_s0 = inlined_call_operand.vmem [shape: f32[16,64], index: 0, kind: input, shape index: {}]   ;;  %s1350_s1 = inlined_call_operand.hbm [shape: f32[96,1024], index: 1, kind: input, shape index: {}]   ;;  %s1351_s2 = inlined_call_operand.vmem [shape: f32[192,128], index: 2, kind: input, shape index: {}]   ;;  %s1352_s3 = inlined_call_operand.vmem [shape: f32[8,256], index: 3, kind: input, shape index: {}]   ;;  %s1353_s4 = inlined_call_operand.vmem [shape: f32[16,640], index: 4, kind: output, shape index: {}]  }
   0x1   :  { %s17_s16 = sshll.u32 %s1046_s15, 4  ;;  %s1022_s19 = scalar_lea.hbm %s1350_s1, 12288  ;;  %s18_s16 = int_to_ptr.vmem [resolvable:$true] %s17_s16 }
   0x2   :  { %p1023_p0 = scmp.ne.s32.totalorder %s1350_s1, %s1022_s19  ;;  %p1026_p1 = scmp.lt.u32.totalorder %s1022_s19, %s1350_s1 }
   0x4   :  { %p1028_p2 = pnand %p1026_p1, %p1023_p0 }
   0x6   :  { %1031 = shalt.err (!%p1028_p2)
}
   0x7   :  { %s1032_s24 = scalar_lea.vmem %s18_s16, 12288  ;;  %p1037_p4 = scmp.lt.s32.totalorder %s18_s16, %s18_s16 }
   0x8   :  { %p1033_p3 = scmp.ne.s32.totalorder %s18_s16, %s1032_s24  ;;  %p1038_p5 = scmp.lt.s32.totalorder %s1032_s24, %s1032_s24 }
   0xa   :  { %p1039_p6 = por %p1038_p5, %p1037_p4 }
   0xc   :  { %p1040_p7 = pnand %p1039_p6, %p1033_p3 }
   0xe   :  { %1043 = shalt.err (!%p1040_p7)
}
   0xf   :  { %s1047_s25 = smov 1024   ;;  %s1048_s26 = smov 64  }
  0x10   :  { %23 = dma.hbm_to_vmem [thread:$0]  %s1350_s1, 12288, %s18_s16, [#allocation3], %s1047_s25, %s1047_s25, %s1048_s26  }
  0x11   :  { %1044 = dma.done.wait [#allocation3], 12288  }
  0x12   :  { %1045 = vsyncadd [#allocation3], 4294955008  ;;  %v33_v0 = vld [vmem:[#allocation2] sm:$0xff]  ;;  %vm42_vm0 = vcmask 523264   ;;  %v126_v13 = vld [vmem:[#allocation2 + $0x18] sm:$0xff]  ;;  %v1049_v38 = vmov 0.0  }
  0x13   :  { %v34_v1 = vld [vmem:[#allocation2 + $0x40] sm:$0xff]  ;;  %v130_v14 = vld [vmem:[#allocation2 + $0x58] sm:$0xff]  ;;  %v125_v19 = vld [vmem:[#allocation2 + $0x10] sm:$0xff]  ;;  %288 = vmatprep.mubr.f32.mxu1 %v1049_v38  ;;  %vm140_vm1 = vcmask 261120   ;;  %s1052_s8 = smov 32   ;;  %vm441_vm2 = vcmask 785408  }
  0x14   :  { %v35_v2 = vld [vmem:[#allocation2 + $0x80] sm:$0xff]  ;;  %v885_v3 = vpack.c.bf16 %v34_v1, %v33_v0  ;;  %v911_v17 = vpack.c.bf16 %v130_v14, %v126_v13  ;;  %v129_v20 = vld [vmem:[#allocation2 + $0x50] sm:$0xff]  ;;  %v124_v22 = vld [vmem:[#allocation2 + $0x8] sm:$0xff]  ;;  %s1053_s27 = smov 17   ;;  %s1054_s6 = smov 96   ;;  %vm769_vm3 = vcmask 392448  }
  0x15   :  { %v36_v4 = vld [vmem:[#allocation2 + $0xc0] sm:$0xff]  ;;  %v901_v21 = vpack.c.bf16 %v129_v20, %v125_v19  ;;  %v128_v23 = vld [vmem:[#allocation2 + $0x48] sm:$0xff]  ;;  %v133_v26 = vld [vmem:[#allocation2 + $0x90] sm:$0xff]  ;;  %s1056_s13 = smov 100   ;;  %vm782_vm4 = vcmask 425344   ;;  %vm801_vm5 = vcmask 433568  }
  0x16   :  { %v889_v5 = vpack.c.bf16 %v36_v4, %v35_v2  ;;  %v37_v6 = vld [vmem:[#allocation2 + $0x100] sm:$0xff]  ;;  %886 = vmatprep.subr.bf16.mxu0 %v885_v3  ;;  %v1105_v24 = vld [vmem:[%s1349_s0 + $0x8] sm:$0xff]  ;;  %v903_v25 = vpack.c.bf16 %v128_v23, %v124_v22  ;;  %v137_v27 = vld [vmem:[#allocation2 + $0xd0] sm:$0xff]  ;;  %vm804_vm6 = vcmask 1047976  }
  0x17   :  { %v38_v7 = vld [vmem:[#allocation2 + $0x140] sm:$0xff]  ;;  %888 = vmatpush3.bf16.msra.mxu0 %v885_v3  ;;  %v905_v29 = vpack.c.bf16 %v137_v27, %v133_v26  ;;  %v132_v31 = vld [vmem:[#allocation2 + $0x88] sm:$0xff]  ;;  %v134_v35 = vld [vmem:[#allocation2 + $0x98] sm:$0xff] }
  0x18   :  { %v1098_v8 = vld [vmem:[%s1349_s0] sm:$0xff]  ;;  %890 = vmatprep.subr.bf16.mxu0 %v889_v5  ;;  %v893_v11 = vpack.c.bf16 %v38_v7, %v37_v6  ;;  %v136_v32 = vld [vmem:[#allocation2 + $0xc8] sm:$0xff]  ;;  %v138_v36 = vld [vmem:[#allocation2 + $0xd8] sm:$0xff] }
  0x19   :  { %863 = vmatprep.mubr.msk.f32.mxu0 %vm42_vm0, %v1098_v8  ;;  %v127_v9 = vld [vmem:[#allocation2 + $0x20] sm:$0xff]  ;;  %v907_v34 = vpack.c.bf16 %v136_v32, %v132_v31  ;;  %v915_v37 = vpack.c.bf16 %v138_v36, %v134_v35  ;;  %v405_v13 = vld [vmem:[#allocation2 + $0x30] sm:$0xff]  ;;  %v408_v22 = vld [vmem:[#allocation2 + $0xa8] sm:$0xff] }
  0x1a   :  { %v131_v10 = vld [vmem:[#allocation2 + $0x60] sm:$0xff]  ;;  %v407_v14 = vld [vmem:[#allocation2 + $0x70] sm:$0xff]  ;;  %v410_v23 = vld [vmem:[#allocation2 + $0xe8] sm:$0xff] }
  0x1b   :  { %v909_v12 = vpack.c.bf16 %v131_v10, %v127_v9  ;;  %v39_v15 = vld [vmem:[#allocation2 + $0x180] sm:$0xff]  ;;  %892 = vmatpush3.bf16.msra.mxu0 %v889_v5  ;;  %v411_v19 = vld [vmem:[#allocation2 + $0xf0] sm:$0xff]  ;;  %v923_v27 = vpack.c.bf16 %v410_v23, %v408_v22  ;;  %v416_v35 = vld [vmem:[#allocation2 + $0x1a8] sm:$0xff] }
  0x1c   :  { %v40_v16 = vld [vmem:[#allocation2 + $0x1c0] sm:$0xff]  ;;  %894 = vmatprep.subr.bf16.mxu0 %v893_v11  ;;  %v415_v26 = vld [vmem:[#allocation2 + $0x170] sm:$0xff]  ;;  %v418_v36 = vld [vmem:[#allocation2 + $0x1e8] sm:$0xff] }
  0x1d   :  { %910 = vmatprep.subr.bf16.mxu1 %v909_v12  ;;  %v897_v18 = vpack.c.bf16 %v40_v16, %v39_v15  ;;  %v135_v28 = vld [vmem:[#allocation2 + $0xa0] sm:$0xff]  ;;  %v404_v15 = vld [vmem:[#allocation2 + $0x28] sm:$0xff]  ;;  %v917_v16 = vpack.c.bf16 %v407_v14, %v405_v13  ;;  %v417_v31 = vld [vmem:[#allocation2 + $0x1b0] sm:$0xff] }
  0x1e   :  { %912 = vmatpush1.bf16.msra.mxu1 %v911_v17  ;;  %v139_v30 = vld [vmem:[#allocation2 + $0xe0] sm:$0xff]  ;;  %v406_v17 = vld [vmem:[#allocation2 + $0x68] sm:$0xff]  ;;  %v419_v32 = vld [vmem:[#allocation2 + $0x1f0] sm:$0xff] }
  0x1f   :  { %896 = vmatpush3.bf16.msra.mxu0 %v893_v11  ;;  %v913_v33 = vpack.c.bf16 %v139_v30, %v135_v28  ;;  %v41_v39 = vld [vmem:[%s1352_s3] ss:$0 sm:$0xff]  ;;  %v315_v11 = vmul.f32 0.1, %v1098_v8  ;;  %v919_v20 = vpack.c.bf16 %v406_v17, %v404_v15  ;;  %v414_v30 = vld [vmem:[#allocation2 + $0x168] sm:$0xff]  ;;  %v531_v14 = vld [vmem:[%s1351_s2 + $0x10] sm:$0xff] }
  0x20   :  { %898 = vmatprep.subr.bf16.mxu0 %v897_v18  ;;  %v530_v13 = vld [vmem:[%s1351_s2 + $0x8] sm:$0xff]  ;;  %v533_v23 = vld [vmem:[%s1351_s2 + $0x20] sm:$0xff] }
  0x21   :  { %914 = vmatprep.subr.bf16.mxu1 %v913_v33 }
  0x22   :  { %916 = vmatpush1.bf16.msra.mxu1 %v915_v37  ;;  %v421_v37 = vld [vmem:[#allocation2 + $0x230] sm:$0xff] }
  0x23   :  { %900 = vmatpush3.bf16.msra.mxu0 %v897_v18  ;;  %v409_v18 = vld [vmem:[#allocation2 + $0xb0] sm:$0xff] }
  0x24   :  { %902 = vmatprep.subr.bf16.mxu0 %v901_v21  ;;  %v921_v21 = vpack.c.bf16 %v411_v19, %v409_v18  ;;  %v532_v18 = vld [vmem:[%s1351_s2 + $0x18] sm:$0xff] }
  0x26   :  { %864 = vmatmul.mubr.msk.f32.vlgmr.msra.gmra.mrb[0].mxu0 %vm42_vm0, %v1105_v24 }
  0x27   :  { %904 = vmatpush1.bf16.msra.mxu0 %v903_v25  ;;  %211 = vmatprep.mubr.f32.mxu0 %v1049_v38  ;;  %v413_v25 = vld [vmem:[#allocation2 + $0x130] sm:$0xff] }
  0x28   :  { %906 = vmatprep.subr.bf16.mxu0 %v905_v29  ;;  %v925_v28 = vpack.c.bf16 %v415_v26, %v413_v25  ;;  %v412_v29 = vld [vmem:[#allocation2 + $0x128] sm:$0xff] }
  0x29   :  { %v927_v33 = vpack.c.bf16 %v414_v30, %v412_v29  ;;  %v534_v25 = vld [vmem:[%s1351_s2 + $0x28] sm:$0xff]  ;;  %v536_v29 = vld [vmem:[%s1351_s2 + $0x38] sm:$0xff] }
  0x2b   :  { %908 = vmatpush1.bf16.msra.mxu0 %v907_v34  ;;  %v929_v34 = vpack.c.bf16 %v419_v32, %v417_v31  ;;  %v537_v32 = vld [vmem:[%s1351_s2 + $0x40] sm:$0xff] }
  0x2c   :  { %918 = vmatprep.subr.bf16.mxu0 %v917_v16 }
  0xf9   :  { %v865_v40 = vpop.f32.mrb[0].mxu0 }
  0xfa   :  { %v1114_v41 = vadd.f32 %v865_v40, %v41_v39  ;;  %v115_v42 = vpop.f32.mrb[1].mxu0  ;;  %v931_v40 = vpack.c.bf16 %v418_v36, %v416_v35  ;;  %v540_v35 = vld [vmem:[%s1351_s2 + $0x58] sm:$0xff] }
  0xfb   :  { %v116_v43 = vadd.f32 %v115_v42, %v41_v39  ;;  %v423_v39 = vld [vmem:[#allocation2 + $0x270] sm:$0xff] }
  0xfc   :  { %v310_v45 = vadd.f32 %v1114_v41, %v1105_v24 }
  0xfd   :  { %814 = vmatmul.mubr.msk.f32.vlgmr.msra.gmra.mrb[2].mxu0 %vm140_vm1, %v116_v43  ;;  %816 = vmatmul.mubr.msk.f32.vlgmr.msra.gmra.mrb[0].mxu1 %vm140_vm1, %v116_v43  ;;  %v309_v44 = vadd.f32 %v116_v43, %v1098_v8  ;;  %v317_v12 = vadd.f32 %v315_v11, %v116_v43 }
  0xfe   :  { %217 = vmatprep.mubr.f32.mxu0 %v1049_v38  ;;  %294 = vmatprep.mubr.f32.mxu1 %v1049_v38  ;;  %v314_v50 = vmul.f32 0.05, %v310_v45  ;;  %v312_v51 = vmul.f32 0.2, %v310_v45  ;;  %v420_v45 = vld [vmem:[#allocation2 + $0x228] sm:$0xff] }
  0xff   :  { %v313_v46 = vmul.f32 0.05, %v309_v44  ;;  %v311_v47 = vmul.f32 0.2, %v309_v44  ;;  %920 = vmatpush1.bf16.msra.mxu0 %v919_v20  ;;  %v933_v44 = vpack.c.bf16 %v423_v39, %v421_v37  ;;  %v1051_v20 = vmov 0.0|0.0   ;;  %v541_v37 = vld [vmem:[%s1351_s2 + $0x60] sm:$0xff] }
 0x100   :  { %v355_v52 = vsel %vm140_vm1, %v314_v50, 0.0  ;;  %v322_v53 = vsel %vm140_vm1, %v312_v51, 0.0  ;;  %922 = vmatprep.subr.bf16.mxu0 %v921_v21  ;;  %941 = vmatprep.subr.bf16.mxu1 %v1051_v20  ;;  %v945_v21 = vpack.c.bf16 %v532_v18, %v531_v14  ;;  %v542_v39 = vld [vmem:[%s1351_s2 + $0x68] sm:$0xff] }
 0x101   :  { %815 = vmatmul.mubr.msk.f32.gmra.mrb[4].mxu0 %vm140_vm1, %v1114_v41  ;;  %817 = vmatmul.mubr.msk.f32.gmra.mrb[2].mxu1 %vm140_vm1, %v1114_v41  ;;  %v352_v48 = vsel %vm140_vm1, %v313_v46, 0.0  ;;  %v319_v49 = vsel %vm140_vm1, %v311_v47, 0.0 }
 0x102   :  { %353 = vadd.xlane.f32.xlu0 %v352_v48  ;;  %320 = vadd.xlane.f32.xlu1 %v319_v49  ;;  %v425_v49 = vld [vmem:[#allocation2 + $0x2b0] sm:$0xff] }
 0x103   :  { %512 = vmatprep.mubr.f32.mxu0 %v1049_v38  ;;  %924 = vmatpush1.bf16.msra.mxu0 %v923_v27  ;;  %v948_v27 = vpack.c.bf16 %v534_v25, %v533_v23 }
 0x104   :  { %926 = vmatprep.subr.bf16.mxu0 %v925_v28  ;;  %v535_v28 = vld [vmem:[%s1351_s2 + $0x30] sm:$0xff] }
 0x105   :  { %v951_v31 = vpack.c.bf16 %v536_v29, %v535_v28 }
 0x106   :  { %356 = vadd.xlane.f32.xlu0 %v355_v52  ;;  %323 = vadd.xlane.f32.xlu1 %v322_v53 }
 0x107   :  { %928 = vmatpush1.bf16.msra.mxu0 %v927_v33  ;;  %v538_v33 = vld [vmem:[%s1351_s2 + $0x48] sm:$0xff] }
 0x108   :  { %930 = vmatprep.subr.bf16.mxu0 %v929_v34  ;;  %v954_v34 = vpack.c.bf16 %v538_v33, %v537_v32 }
 0x10b   :  { %932 = vmatpush1.bf16.msra.mxu0 %v931_v40  ;;  %v960_v40 = vpack.c.bf16 %v542_v39, %v541_v37 }
 0x10c   :  { %934 = vmatprep.subr.bf16.mxu0 %v933_v44 }
 0x18f   :  { %v354_v54 = vpop.xlane.xlu0 %353  ;;  %v321_v55 = vpop.xlane.xlu1 %320 }
 0x190   :  { %v358_v56 = vmul.f32 0.03125, %v354_v54  ;;  %v326_v57 = vmul.f32 0.03125, %v321_v55 }
 0x192   :  { %v1132_v58 = vsub.f32 %v313_v46, %v358_v56  ;;  %v1134_v59 = vsub.f32 %v311_v47, %v326_v57  ;;  %v422_v46 = vld [vmem:[#allocation2 + $0x268] sm:$0xff] }
 0x193   :  { %v357_v60 = vpop.xlane.xlu0 %356  ;;  %v324_v61 = vpop.xlane.xlu1 %323 }
 0x194   :  { %v359_v62 = vmul.f32 0.03125, %v357_v60  ;;  %v327_v63 = vmul.f32 0.03125, %v324_v61  ;;  %v362_v0 = vmul.f32 %v1132_v58, %v1132_v58  ;;  %v330_v4 = vmul.f32 %v1134_v59, %v1134_v59 }
 0x196   :  { %v1138_v1 = vsub.f32 %v314_v50, %v359_v62  ;;  %v1140_v2 = vsub.f32 %v312_v51, %v327_v63  ;;  %v364_v3 = vsel %vm140_vm1, %v362_v0, 0.0  ;;  %v332_v7 = vsel %vm140_vm1, %v330_v4, 0.0  ;;  %v427_v50 = vld [vmem:[#allocation2 + $0x2f0] sm:$0xff]  ;;  %v424_v0 = vld [vmem:[#allocation2 + $0x2a8] sm:$0xff] }
 0x197   :  { %365 = vadd.xlane.f32.xlu0 %v364_v3  ;;  %v935_v51 = vpack.c.bf16 %v422_v46, %v420_v45  ;;  %v937_v54 = vpack.c.bf16 %v427_v50, %v425_v49  ;;  %v426_v3 = vld [vmem:[#allocation2 + $0x2e8] sm:$0xff]  ;;  %v545_v45 = vld [vmem:[%s1351_s2 + $0x80] sm:$0xff]  ;;  %v548_v49 = vld [vmem:[%s1351_s2 + $0x98] sm:$0xff] }
 0x198   :  { %v363_v5 = vmul.f32 %v1138_v1, %v1138_v1  ;;  %v331_v9 = vmul.f32 %v1140_v2, %v1140_v2  ;;  %v546_v46 = vld [vmem:[%s1351_s2 + $0x88] sm:$0xff] }
 0x199   :  { %936 = vmatpush1.bf16.msra.mxu0 %v935_v51 }
 0x19a   :  { %v367_v6 = vsel %vm140_vm1, %v363_v5, 0.0  ;;  %v335_v10 = vsel %vm140_vm1, %v331_v9, 0.0  ;;  %938 = vmatprep.subr.bf16.mxu0 %v937_v54  ;;  %v939_v5 = vpack.c.bf16 %v426_v3, %v424_v0  ;;  %v349_v0 = vld [vmem:[%s1352_s3 + $0x2] ss:$0 sm:$0xff] }
 0x19b   :  { %368 = vadd.xlane.f32.xlu1 %v367_v6  ;;  %333 = vadd.xlane.f32.xlu0 %v332_v7  ;;  %v378_v7 = vld [vmem:[%s1352_s3 + $0x3] ss:$0 sm:$0xff] }
 0x19d   :  { %940 = vmatpush1.bf16.msra.mxu0 %v939_v5 }
 0x19f   :  { %336 = vadd.xlane.f32.xlu1 %v335_v10  ;;  %v381_v10 = vld [vmem:[%s1352_s3 + $0x4] ss:$0 sm:$0xff] }
 0x1b0   :  { %394 = vrot.lane.b32.xlu1 %v317_v12, %s1048_s26  ;;  %v529_v12 = vld [vmem:[%s1351_s2] sm:$0xff] }
 0x1b1   :  { %v942_v17 = vpack.c.bf16 %v530_v13, %v529_v12 }
 0x1b3   :  { %943 = vmatpush1.bf16.msra.mxu1 %v942_v17  ;;  %v552_v17 = vld [vmem:[%s1351_s2 + $0xb8] sm:$0xff] }
 0x1b4   :  { %944 = vmatprep.subr.bf16.mxu1 %v1051_v20 }
 0x1b7   :  { %946 = vmatpush1.bf16.msra.mxu1 %v945_v21 }
 0x1b8   :  { %947 = vmatprep.subr.bf16.mxu1 %v1051_v20 }
 0x1bb   :  { %949 = vmatpush1.bf16.msra.mxu1 %v948_v27 }
 0x1bc   :  { %950 = vmatprep.subr.bf16.mxu1 %v1051_v20 }
 0x1bf   :  { %952 = vmatpush1.bf16.msra.mxu1 %v951_v31 }
 0x1c0   :  { %953 = vmatprep.subr.bf16.mxu1 %v1051_v20 }
 0x1c3   :  { %955 = vmatpush1.bf16.msra.mxu1 %v954_v34 }
 0x1c4   :  { %956 = vmatprep.subr.bf16.mxu1 %v1051_v20 }
 0x1d0   :  { %v213_v42 = vpop.f32.mrb[2].mxu0  ;;  %v290_v43 = vpop.f32.mrb[0].mxu1 }
 0x1d1   :  { %301 = vst [vmem:[%s1353_s4 + $0x8] sm:$0xff] %v213_v42  ;;  %303 = vst [vmem:[%s1353_s4 + $0x18] sm:$0xff] %v290_v43  ;;  %v215_v47 = vpop.f32.mrb[3].mxu0  ;;  %v292_v48 = vpop.f32.mrb[1].mxu1  ;;  %v543_v42 = vld [vmem:[%s1351_s2 + $0x70] sm:$0xff]  ;;  %v544_v43 = vld [vmem:[%s1351_s2 + $0x78] sm:$0xff] }
 0x1d2   :  { %302 = vst [vmem:[%s1353_s4 + $0x10] sm:$0xff] %v215_v47  ;;  %304 = vst [vmem:[%s1353_s4 + $0x20] sm:$0xff] %v292_v48  ;;  %v963_v44 = vpack.c.bf16 %v544_v43, %v543_v42  ;;  %v966_v47 = vpack.c.bf16 %v546_v46, %v545_v45  ;;  %v547_v48 = vld [vmem:[%s1351_s2 + $0x90] sm:$0xff]  ;;  %v640_v45 = vld [vmem:[#allocation2 + $0xf8] sm:$0xff] }
 0x1d3   :  { %v969_v50 = vpack.c.bf16 %v548_v49, %v547_v48  ;;  %v642_v48 = vld [vmem:[#allocation2 + $0x178] sm:$0xff] }
 0x1d4   :  { %v219_v52 = vpop.f32.mrb[4].mxu0  ;;  %v296_v53 = vpop.f32.mrb[2].mxu1 }
 0x1d5   :  { %305 = vst [vmem:[%s1353_s4 + $0x30] sm:$0xff] %v219_v52  ;;  %307 = vst [vmem:[%s1353_s4 + $0x40] sm:$0xff] %v296_v53  ;;  %v221_v55 = vpop.f32.mrb[5].mxu0  ;;  %v298_v56 = vpop.f32.mrb[3].mxu1 }
 0x1d6   :  { %306 = vst [vmem:[%s1353_s4 + $0x38] sm:$0xff] %v221_v55  ;;  %308 = vst [vmem:[%s1353_s4 + $0x48] sm:$0xff] %v298_v56 }
 0x224   :  { %v366_v57 = vpop.xlane.xlu0 %365 }
 0x225   :  { %v370_v60 = vmul.f32 0.03125, %v366_v57 }
 0x227   :  { %v372_v61 = vadd.f32 1e-05, %v370_v60 }
 0x228   :  { %v369_v62 = vpop.xlane.xlu1 %368  ;;  %v334_v51 = vpop.xlane.xlu0 %333 }
 0x229   :  { %1006 = vrsqrt.f32 %v372_v61  ;;  %v371_v63 = vmul.f32 0.03125, %v369_v62  ;;  %v338_v52 = vmul.f32 0.03125, %v334_v51  ;;  %v346_v61 = vld [vmem:[%s1352_s3 + $0x1] ss:$0 sm:$0xff]  ;;  %v644_v51 = vld [vmem:[#allocation2 + $0x1f8] sm:$0xff] }
 0x22b   :  { %v373_v4 = vadd.f32 1e-05, %v371_v63  ;;  %v340_v53 = vadd.f32 1e-05, %v338_v52 }
 0x22c   :  { %v337_v54 = vpop.xlane.xlu1 %336 }
 0x22d   :  { %1008 = vrsqrt.f32 %v373_v4  ;;  %v339_v55 = vmul.f32 0.03125, %v337_v54 }
 0x22e   :  { %1010 = vrsqrt.f32 %v340_v53 }
 0x22f   :  { %v341_v56 = vadd.f32 1e-05, %v339_v55 }
 0x231   :  { %1012 = vrsqrt.f32 %v341_v56 }
 0x233   :  { %v1007_v6 = vpop.eup %1006 }
 0x234   :  { %v376_v9 = vmul.f32 %v1007_v6, %v1132_v58  ;;  %v1050_v58 = vmov 63   ;;  %v395_v6 = vpop.permute.xlu1 %394 }
 0x235   :  { %1004 = vset.pattern.permute.xlu0 %v1050_v58  ;;  %1005 = vset.pattern.permute.xlu1 %v1050_v58  ;;  %v551_v58 = vld [vmem:[%s1351_s2 + $0xb0] sm:$0xff] }
 0x236   :  { %v379_v11 = vmul.f32 %v378_v7, %v376_v9  ;;  %v975_v18 = vpack.c.bf16 %v552_v17, %v551_v58 }
 0x237   :  { %v1009_v15 = vpop.eup %1008 }
 0x238   :  { %v382_v16 = vadd.f32 %v381_v10, %v379_v11  ;;  %v377_v19 = vmul.f32 %v1009_v15, %v1138_v1  ;;  %v316_v1 = vmul.f32 0.1, %v1105_v24  ;;  %v1011_v57 = vpop.eup %1010  ;;  %v550_v15 = vld [vmem:[%s1351_s2 + $0xa8] sm:$0xff] }
 0x239   :  { %v344_v60 = vmul.f32 %v1011_v57, %v1134_v59  ;;  %v553_v57 = vld [vmem:[%s1352_s3 + $0x6] ss:$0 sm:$0xff] }
 0x23a   :  { %386 = vrot.lane.b32.xlu0 %v382_v16, %s1052_s8  ;;  %v380_v22 = vmul.f32 %v378_v7, %v377_v19  ;;  %v318_v30 = vadd.f32 %v316_v1, %v1114_v41  ;;  %v539_v41 = vld [vmem:[%s1351_s2 + $0x50] sm:$0xff]  ;;  %v431_v19 = vlaneseq }
 0x23b   :  { %v957_v36 = vpack.c.bf16 %v540_v35, %v539_v41  ;;  %v347_v62 = vmul.f32 %v346_v61, %v344_v60  ;;  %v1013_v63 = vpop.eup %1012 }
 0x23c   :  { %v383_v26 = vadd.f32 %v381_v10, %v380_v22  ;;  %v345_v4 = vmul.f32 %v1013_v63, %v1140_v2  ;;  %v549_v2 = vld [vmem:[%s1351_s2 + $0xa0] sm:$0xff]  ;;  %v432_v21 = vshrl.u32 %v431_v19, 7 }
 0x23d   :  { %958 = vmatpush1.bf16.msra.mxu1 %v957_v36  ;;  %v350_v3 = vadd.f32 %v349_v0, %v347_v62  ;;  %v972_v16 = vpack.c.bf16 %v550_v15, %v549_v2 }
 0x23e   :  { %740 = vperm.xlu0 %1004, %v1098_v8   ;;  %388 = vrot.lane.b32.xlu1 %v383_v26, %s1052_s8  ;;  %v348_v9 = vmul.f32 %v346_v61, %v345_v4  ;;  %v433_v22 = vsub.s32 0, %v432_v21  ;;  %v437_v23 = vsub.s32 1, %v432_v21 }
 0x23f   :  { %959 = vmatprep.subr.bf16.mxu1 %v1051_v20 }
 0x240   :  { %v351_v11 = vadd.f32 %v349_v0, %v348_v9 }
 0x241   :  { %961 = vmatpush1.bf16.msra.mxu1 %v960_v40 }
 0x242   :  { %396 = vrot.lane.b32.xlu1 %v318_v30, %s1048_s26  ;;  %962 = vmatprep.subr.bf16.mxu1 %v1051_v20  ;;  %v638_v30 = vld [vmem:[#allocation2 + $0x78] sm:$0xff] }
 0x243   :  { %787 = vrot.lane.b32.xlu0 %v1105_v24, %s1053_s27 }
 0x245   :  { %964 = vmatpush1.bf16.msra.mxu1 %v963_v44  ;;  %v639_v44 = vld [vmem:[#allocation2 + $0xb8] sm:$0xff] }
 0x246   :  { %744 = vperm.xlu1 %1005, %v1105_v24   ;;  %965 = vmatprep.subr.bf16.mxu1 %v1051_v20  ;;  %v981_v46 = vpack.c.bf16 %v640_v45, %v639_v44 }
 0x249   :  { %967 = vmatpush1.bf16.msra.mxu1 %v966_v47  ;;  %v641_v47 = vld [vmem:[#allocation2 + $0x138] sm:$0xff] }
 0x24a   :  { %968 = vmatprep.subr.bf16.mxu1 %v1051_v20  ;;  %785 = vrot.lane.b32.xlu1 %v1098_v8, %s1053_s27  ;;  %v637_v8 = vld [vmem:[#allocation2 + $0x38] sm:$0xff]  ;;  %v985_v49 = vpack.c.bf16 %v642_v48, %v641_v47 }
 0x24b   :  { %v977_v24 = vpack.c.bf16 %v638_v30, %v637_v8 }
 0x24d   :  { %970 = vmatpush1.bf16.msra.mxu1 %v969_v50  ;;  %978 = vmatprep.subr.bf16.mxu0 %v977_v24  ;;  %v643_v50 = vld [vmem:[#allocation2 + $0x1b8] sm:$0xff] }
 0x24e   :  { %971 = vmatprep.subr.bf16.mxu1 %v1051_v20  ;;  %v989_v52 = vpack.c.bf16 %v644_v51, %v643_v50 }
 0x251   :  { %973 = vmatpush1.bf16.msra.mxu1 %v972_v16 }
 0x252   :  { %974 = vmatprep.subr.bf16.mxu1 %v1051_v20  ;;  %v818_v20 = vld [vmem:[%s1352_s3 + $0x5] ss:$8 sm:$0x3] }
 0x253   :  { %v434_v25 = vrot.slane %v818_v20, %v433_v22  ;;  %v438_v26 = vrot.slane %v818_v20, %v437_v23 }
 0x255   :  { %976 = vmatpush1.bf16.msra.mxu1 %v975_v18 }
 0x2ac   :  { %v387_v5 = vpop.permute.xlu0 %386 }
 0x2ad   :  { %v400_v7 = vsel %vm140_vm1, %v350_v3, %v387_v5 }
 0x2ae   :  { %v402_v59 = vsel %vm42_vm0, %v400_v7, %v395_v6 }
 0x2af   :  { %819 = vmatmul.mubr.msk.f32.vlgmr.msra.gmra.mrb[6].mxu0 %vm441_vm2, %v402_v59 }
 0x2b0   :  { %518 = vmatprep.mubr.f32.mxu0 %v1049_v38  ;;  %v389_v10 = vpop.permute.xlu1 %388  ;;  %980 = vmatpush3.bf16.msra.mxu0 %v977_v24 }
 0x2b1   :  { %v401_v12 = vsel %vm140_vm1, %v351_v11, %v389_v10  ;;  %982 = vmatprep.subr.bf16.mxu0 %v981_v46  ;;  %v645_v10 = vld [vmem:[%s1352_s3 + $0x7] ss:$0 sm:$0xff]  ;;  %s1055_s3 = smov 48  }
 0x2b4   :  { %v397_v13 = vpop.permute.xlu1 %396  ;;  %984 = vmatpush3.bf16.msra.mxu0 %v981_v46 }
 0x2b5   :  { %v403_v14 = vsel %vm42_vm0, %v401_v12, %v397_v13  ;;  %986 = vmatprep.subr.bf16.mxu0 %v985_v49 }
 0x2b6   :  { %820 = vmatmul.mubr.msk.f32.gmra.mrb[8].mxu0 %vm441_vm2, %v403_v14 }
 0x2b8   :  { %988 = vmatpush3.bf16.msra.mxu0 %v985_v49 }
 0x2b9   :  { %990 = vmatprep.subr.bf16.mxu0 %v989_v52 }
 0x2bc   :  { %992 = vmatpush3.bf16.msra.mxu0 %v989_v52 }
 0x2bd   :  { %v1293_v29 = vpop.permute.xlu0 %740 }
 0x2c1   :  { %v788_v55 = vpop.permute.xlu0 %787 }
 0x2c5   :  { %v1298_v37 = vpop.permute.xlu1 %744 }
 0x2c9   :  { %v786_v53 = vpop.permute.xlu1 %785 }
 0x382   :  { %v514_v1 = vpop.f32.mrb[6].mxu0 }
 0x383   :  { %v515_v27 = vadd.f32 %v514_v1, %v434_v25  ;;  %v516_v28 = vpop.f32.mrb[7].mxu0 }
 0x384   :  { %v517_v31 = vadd.f32 %v516_v28, %v438_v26 }
 0x385   :  { %v525_v34 = vmax.f32 %v515_v27, 0.0 }
 0x386   :  { %v526_v32 = vmax.f32 %v517_v31, 0.0  ;;  %v747_v33 = vmul.f32 %v1293_v29, %v517_v31 }
 0x388   :  { %751 = vrot.lane.b32.xlu1 %v747_v33, %s1048_s26  ;;  %821 = vmatprep.mubr.msk.f32.mxu1 %vm42_vm0, %v526_v32 }
 0x389   :  { %625 = vmatmul.mubr.f32.vlgmr.msra.gmra.mrb[4].mxu1 %v525_v34  ;;  %v520_v41 = vpop.f32.mrb[8].mxu0 }
 0x38a   :  { %v521_v35 = vadd.f32 %v520_v41, %v434_v25  ;;  %v522_v36 = vpop.f32.mrb[9].mxu0 }
 0x38b   :  { %v523_v39 = vadd.f32 %v522_v36, %v438_v26 }
 0x38c   :  { %v527_v43 = vmax.f32 %v521_v35, 0.0 }
 0x38d   :  { %v528_v40 = vmax.f32 %v523_v39, 0.0  ;;  %v748_v42 = vmul.f32 %v1298_v37, %v523_v39 }
 0x38f   :  { %753 = vrot.lane.b32.xlu0 %v748_v42, %s1048_s26  ;;  %822 = vmatprep.mubr.msk.f32.mxu1 %vm42_vm0, %v528_v40 }
 0x390   :  { %630 = vmatmul.mubr.f32.gmra.mrb[6].mxu1 %v527_v43 }
 0x3fa   :  { %v752_v54 = vpop.permute.xlu1 %751 }
 0x3fb   :  { %757 = vst.msk [vmem:[%s1353_s4] sm:$0xff] %vm140_vm1, %v752_v54 }
 0x401   :  { %v754_v56 = vpop.permute.xlu0 %753 }
 0x402   :  { %758 = vst.msk [vmem:[%s1353_s4 + $0x28] sm:$0xff] %vm140_vm1, %v754_v56 }
 0x45c   :  { %v626_v60 = vpop.f32.mrb[4].mxu1 }
 0x45d   :  { %v627_v61 = vadd.f32 %v626_v60, %v553_v57  ;;  %v628_v62 = vpop.f32.mrb[5].mxu1 }
 0x45f   :  { %v635_v63 = vmax.f32 %v627_v61, 0.0  ;;  %v759_v0 = vmul.f32 %v1293_v29, %v627_v61  ;;  %v791_v25 = vmul.f32 %v786_v53, %v627_v61 }
 0x461   :  { %763 = vrot.lane.b32.xlu1 %v759_v0, %s1054_s6  ;;  %882 = vmatprep.mubr.msk.f32.mxu0 %vm42_vm0, %v635_v63 }
 0x463   :  { %v631_v3 = vpop.f32.mrb[6].mxu1 }
 0x464   :  { %v632_v4 = vadd.f32 %v631_v3, %v553_v57  ;;  %v633_v5 = vpop.f32.mrb[7].mxu1 }
 0x466   :  { %v636_v6 = vmax.f32 %v632_v4, 0.0  ;;  %v760_v7 = vmul.f32 %v1298_v37, %v632_v4  ;;  %v792_v23 = vmul.f32 %v788_v55, %v632_v4 }
 0x468   :  { %765 = vrot.lane.b32.xlu0 %v760_v7, %s1054_s6  ;;  %883 = vmatmul.mubr.msk.f32.vlgmr.msra.gmra.mrb[10].mxu0 %vm42_vm0, %v636_v6 }
 0x4d3   :  { %v764_v59 = vpop.permute.xlu1 %763 }
 0x4d4   :  { %770 = vst.msk [vmem:[%s1353_s4] sm:$0xff] %vm769_vm3, %v764_v59 }
 0x4da   :  { %v766_v9 = vpop.permute.xlu0 %765 }
 0x4db   :  { %771 = vst.msk [vmem:[%s1353_s4 + $0x28] sm:$0xff] %vm769_vm3, %v766_v9 }
 0x53b   :  { %v884_v11 = vpop.f32.mrb[10].mxu0 }
 0x53c   :  { %v724_v12 = vadd.f32 %v884_v11, %v645_v10  ;;  %v718_v13 = vpop.f32.mrb[11].mxu0 }
 0x53d   :  { %v719_v14 = vadd.f32 %v718_v13, %v645_v10 }
 0x53e   :  { %v826_v2 = vmul.f32 -1.442695, %v724_v12 }
 0x53f   :  { %v825_v15 = vmul.f32 -1.442695, %v719_v14 }
 0x540   :  { %1014 = vpow2.f32 %v826_v2 }
 0x541   :  { %1016 = vpow2.f32 %v825_v15 }
 0x54a   :  { %v1015_v16 = vpop.eup %1014 }
 0x54b   :  { %v1017_v58 = vpop.eup %1016  ;;  %v734_v17 = vadd.f32 1.0, %v1015_v16 }
 0x54c   :  { %v733_v18 = vadd.f32 1.0, %v1017_v58 }
 0x54d   :  { %1018 = vrcp.f32 %v734_v17 }
 0x54e   :  { %1020 = vrcp.f32 %v733_v18 }
 0x557   :  { %v1019_v19 = vpop.eup %1018 }
 0x558   :  { %v1021_v21 = vpop.eup %1020  ;;  %v773_v22 = vmul.f32 %v1019_v19, %v1298_v37 }
 0x559   :  { %v772_v20 = vmul.f32 %v1021_v21, %v1293_v29 }
 0x55a   :  { %778 = vrot.lane.b32.xlu0 %v773_v22, %s1055_s3 }
 0x55b   :  { %776 = vrot.lane.b32.xlu1 %v772_v20, %s1055_s3 }
 0x55e   :  { %797 = vrot.lane.b32.xlu0 %v792_v23, %s1056_s13 }
 0x55f   :  { %795 = vrot.lane.b32.xlu1 %v791_v25, %s1056_s13 }
 0x5cc   :  { %v779_v26 = vpop.permute.xlu0 %778 }
 0x5cd   :  { %784 = vst.msk [vmem:[%s1353_s4 + $0x28] sm:$0xff] %vm782_vm4, %v779_v26  ;;  %v777_v1 = vpop.permute.xlu1 %776 }
 0x5ce   :  { %783 = vst.msk [vmem:[%s1353_s4] sm:$0xff] %vm782_vm4, %v777_v1 }
 0x5d0   :  { %v798_v27 = vpop.permute.xlu0 %797 }
 0x5d1   :  { %803 = vst.msk [vmem:[%s1353_s4 + $0x28] sm:$0xff] %vm801_vm5, %v798_v27  ;;  %v796_v28 = vpop.permute.xlu1 %795 }
 0x5d2   :  { %806 = vst.msk [vmem:[%s1353_s4 + $0x28] sm:$0xff] %vm804_vm6, %v1049_v38 }
 0x5d3   :  { %802 = vst.msk [vmem:[%s1353_s4] sm:$0xff] %vm801_vm5, %v796_v28 }
 0x5d4   :  { %805 = vst.msk [vmem:[%s1353_s4] sm:$0xff] %vm804_vm6, %v1049_v38 }
 0x5d5   :  { %811 = vsyncpa [#allocation3], 1 }

</bundles_post_ra>
